<compile_context>
chip_gen: v6e
topology: v6e:2x2x1
jax: 0.10.0
libtpu: 0.0.40
codegen_flags: <defaults>
</compile_context>

<pallas_src>
import math

import jax
import jax.numpy as jnp
from jax.experimental import pallas as pl
from jax.experimental.pallas import tpu as pltpu


def _make_vq_kernel(score_in_bf16: bool):
    def _vq_kernel(x_ref, embed_t_ref, embed_ref, e2h_ref, q_ref, idx_ref):
        """One tile of tokens vs. the full (lane-padded) codebook.

        x_ref       : (tm, D)  f32  token tile
        embed_t_ref : (D, Kp)  f32  codebook transposed (resident, single copy)
        embed_ref   : (Kp, D)  f32  codebook (resident, single copy)
        e2h_ref     : (1, Kp)  f32  0.5*||e||^2 (+BIG for padded rows)
        q_ref       : (tm, D)  f32  quantized output tile
        idx_ref     : (1, tm)  i32  nearest-code indices (lane-dense output)
        """
        x = x_ref[...]                       # (tm, D)
        et = embed_t_ref[...]                # (D, Kp)
        if score_in_bf16:
            x = x.astype(jnp.bfloat16)
            et = et.astype(jnp.bfloat16)

        # argmax_k -(||x||^2 - 2 x.e_k + ||e_k||^2) == argmax_k (x.e_k - 0.5*||e_k||^2)
        # (||x||^2 is constant per row; the 2x is pre-folded into e2h at init).
        score = jnp.dot(x, et, preferred_element_type=jnp.float32) - e2h_ref[...]

        kp = score.shape[-1]
        iota = jax.lax.broadcasted_iota(jnp.int32, score.shape, 1)   # (tm, Kp)
        rowmax = jnp.max(score, axis=-1, keepdims=True)              # (tm, 1)
        # First index achieving the row max (argmax tie-break), without the
        # index-carrying argmax reduction.
        idx = jnp.min(jnp.where(score == rowmax, iota, kp), axis=-1).astype(jnp.int32)
        idx_ref[...] = idx[None, :]                                  # lane-dense store

        # Dequantize: strictly one-hot gather on the MXU (entries 0/1 -> exact).
        onehot = (iota == idx[:, None]).astype(jnp.float32)          # (tm, Kp)
        q_ref[...] = jnp.dot(onehot, embed_ref[...],
                             preferred_element_type=jnp.float32)

    return _vq_kernel


def _vmem_capacity_bytes():
    try:
        return int(pltpu.get_tpu_info().vmem_capacity_bytes)
    except Exception:
        return 64 << 20   # conservative fallback = v7x per-core VMEM


def _vmem_need_bytes(tm, kp, d):
    """Rough per-core VMEM footprint (f32 upper bound)."""
    return 4 * (
        2 * kp * d        # resident codebook + transposed copy (single-buffered)
        + kp              # resident 0.5*||e||^2
        + 2 * 2 * tm * d  # x and q tiles, double-buffered
        + 2 * tm          # idx tiles, double-buffered
        + 4 * tm * kp     # score / iota / one-hot / select intermediates
    )


def _vq_flat(x_flat, embed_t, embed_pad, e2_half, *, tm, score_in_bf16):
    """x_flat (M, D) f32 -> (quantized (M, D) f32, idx (M,) int32).

    No padding of M: grid = cdiv(M, tm); Pallas masks the ragged last block.
    """
    m, d = x_flat.shape
    kp = embed_pad.shape[0]
    n_tiles = pl.cdiv(m, tm)

    cap = _vmem_capacity_bytes()
    vmem_limit = int(min(max(2 * _vmem_need_bytes(tm, kp, d), 32 << 20),
                         cap * 3 // 4))

    q, idx = pl.pallas_call(
        _make_vq_kernel(score_in_bf16),
        out_shape=(
            jax.ShapeDtypeStruct((m, d), jnp.float32),
            jax.ShapeDtypeStruct((1, m), jnp.int32),     # lane-dense index output
        ),
        grid=(n_tiles,),
        in_specs=[
            pl.BlockSpec((tm, d), lambda i: (i, 0)),                 # token tile
            pl.BlockSpec(memory_space=pltpu.MemorySpace.VMEM),       # E^T resident
            pl.BlockSpec(memory_space=pltpu.MemorySpace.VMEM),       # E   resident
            pl.BlockSpec(memory_space=pltpu.MemorySpace.VMEM),       # 0.5*||e||^2
        ],
        out_specs=(
            pl.BlockSpec((tm, d), lambda i: (i, 0)),
            pl.BlockSpec((1, tm), lambda i: (0, i)),
        ),
        compiler_params=pltpu.CompilerParams(
            dimension_semantics=("parallel",),
            vmem_limit_bytes=vmem_limit,
        ),
    )(x_flat, embed_t, embed_pad, e2_half)
    return q, idx.reshape(m)


class EuclideanCodebookPallas:
    """Eval-mode forward of espnet2 EuclideanCodebook (kmeans_init=False path)."""

    LANE = 128

    def __init__(self, dim, codebook_size, key, token_tile=512, score_in_bf16=False):
        self.dim = dim
        self.codebook_size = codebook_size
        self.token_tile = token_tile          # should be a multiple of 128
        self.score_in_bf16 = score_in_bf16    # optional bf16 score matmul (flagged)

        # uniform_init == kaiming_uniform_: bound = sqrt(6 / fan_in), fan_in = dim.
        bound = math.sqrt(6.0 / dim)
        self.embed = jax.random.uniform(
            key, (codebook_size, dim), dtype=jnp.float32, minval=-bound, maxval=bound
        )

        # Pad K up to a lane multiple once (codebook is static); padded codes are
        # excluded from the argmax by a huge half-norm.
        kp = -(-codebook_size // self.LANE) * self.LANE
        embed_pad = jnp.zeros((kp, dim), jnp.float32).at[:codebook_size].set(self.embed)
        e2_half = 0.5 * jnp.sum(embed_pad * embed_pad, axis=1)
        e2_half = e2_half.at[codebook_size:].set(jnp.float32(1e30))
        self._embed_pad = embed_pad                       # (Kp, D)  dequant operand
        self._embed_t = jnp.asarray(embed_pad.T)          # (D, Kp)  score operand
        self._e2_half = e2_half[None, :]                  # (1, Kp)

    def _pick_tile(self, m, d):
        if m <= self.token_tile:
            return m                                      # single full-extent block
        kp = self._embed_pad.shape[0]
        cap = _vmem_capacity_bytes()
        tm = self.token_tile
        while tm > 128 and 2 * _vmem_need_bytes(tm, kp, d) > cap * 3 // 4:
            tm //= 2                                      # stays a multiple of 128
        return tm

    def __call__(self, x):
        """x: (B, T, D) f32 -> (quantize (B, T, D) f32, embed_ind (B, T) int32)."""
        b, t, d = x.shape
        assert d == self.dim
        m = b * t
        x_flat = x.reshape(m, d).astype(jnp.float32)      # already (..., D): no transpose

        tm = self._pick_tile(m, d)
        q_flat, idx_flat = _vq_flat(
            x_flat, self._embed_t, self._embed_pad, self._e2_half,
            tm=tm, score_in_bf16=self.score_in_bf16,
        )
        return q_flat.reshape(b, t, d), idx_flat.reshape(b, t)


def _reference(x, embed):
    """Pure-JAX reference matching the PyTorch eval forward."""
    b, t, d = x.shape
    xf = x.reshape(b * t, d)
    dist = -(jnp.sum(xf**2, axis=1, keepdims=True)
             - 2.0 * xf @ embed.T
             + jnp.sum(embed**2, axis=1, keepdims=True).T)
    idx = jnp.argmax(dist, axis=-1)
    q = embed[idx]
    return q.reshape(b, t, d), idx.reshape(b, t)


if __name__ == "__main__":
    key = jax.random.PRNGKey(0)
    k_embed, k_x1, k_x2 = jax.random.split(key, 3)

    B, T, D = 2, 16, 64      # x is (B, T, D) as in EuclideanCodebook.forward
    K = 200                  # codebook_size (exercises lane-padding to 256)

    cb = EuclideanCodebookPallas(dim=D, codebook_size=K, key=k_embed)

    # Case 1: small batch, single full-extent tile.
    x = jax.random.normal(k_x1, (B, T, D), dtype=jnp.float32)
    quantize, embed_ind = cb(x)
    jax.block_until_ready((quantize, embed_ind))

    q_ref, idx_ref = _reference(x, cb.embed)
    assert quantize.shape == (B, T, D)
    assert embed_ind.shape == (B, T)
    assert int(embed_ind.min()) >= 0 and int(embed_ind.max()) < K
    assert jnp.array_equal(embed_ind.astype(jnp.int32), idx_ref.astype(jnp.int32))
    assert jnp.allclose(quantize, q_ref, atol=1e-5, rtol=1e-5)

    # Case 2: M not a multiple of the token tile -> multi-step grid with a ragged
    # last block (no wrapper-side padding or output slicing).
    B2, T2 = 3, 200          # M = 600 -> grid = cdiv(600, 512) = 2
    x2 = jax.random.normal(k_x2, (B2, T2, D), dtype=jnp.float32)
    q2, i2 = cb(x2)
    jax.block_until_ready((q2, i2))

    q2_ref, i2_ref = _reference(x2, cb.embed)
    assert q2.shape == (B2, T2, D) and i2.shape == (B2, T2)
    assert jnp.array_equal(i2.astype(jnp.int32), i2_ref.astype(jnp.int32))
    assert jnp.allclose(q2, q2_ref, atol=1e-5, rtol=1e-5)

    print("KERNEL_OK")
</pallas_src>

<mosaic_0001>
module attributes {stable_mosaic.version = 11 : i64} {
  func.func @_vq_kernel(%arg0: i32, %arg1: memref<32x64xf32, #tpu.memory_space<vmem>>, %arg2: memref<64x256xf32, #tpu.memory_space<vmem>>, %arg3: memref<256x64xf32, #tpu.memory_space<vmem>>, %arg4: memref<1x256xf32, #tpu.memory_space<vmem>>, %arg5: memref<32x64xf32, #tpu.memory_space<vmem>>, %arg6: memref<1x32xi32, #tpu.memory_space<vmem>>) attributes {dimension_semantics = [#tpu.dimension_semantics<parallel>], iteration_bounds = array<i64: 1>, scalar_prefetch = 0 : i64, scratch_operands = 0 : i64, tpu.core_type = #tpu.core_type<tc>, window_params = [{transform_indices = @transform_0, window_bounds = array<i64: 32, 64>}, {pipeline_mode = #tpu.pipeline_mode<synchronous>, transform_indices = @transform_1, window_bounds = array<i64: 64, 256>}, {pipeline_mode = #tpu.pipeline_mode<synchronous>, transform_indices = @transform_2, window_bounds = array<i64: 256, 64>}, {pipeline_mode = #tpu.pipeline_mode<synchronous>, transform_indices = @transform_3, window_bounds = array<i64: 1, 256>}, {transform_indices = @transform_4, window_bounds = array<i64: 32, 64>}, {transform_indices = @transform_5, window_bounds = array<i64: 1, 32>}]} {
    %c0 = arith.constant 0 : index
    %c0_0 = arith.constant 0 : index
    %0 = vector.load %arg1[%c0, %c0_0] : memref<32x64xf32, #tpu.memory_space<vmem>>, vector<32x64xf32>
    %c0_1 = arith.constant 0 : index
    %c0_2 = arith.constant 0 : index
    %1 = vector.load %arg2[%c0_1, %c0_2] : memref<64x256xf32, #tpu.memory_space<vmem>>, vector<64x256xf32>
    %cst = arith.constant dense<0.000000e+00> : vector<32x256xf32>
    %2 = tpu.matmul %0, %1, %cst {dimension_numbers = #tpu.dot_dimension_numbers<[1], [0], [0], [1], [0, 0, 1, 1], [], []>} : vector<32x64xf32>, vector<64x256xf32>, vector<32x256xf32> -> vector<32x256xf32>
    %c0_3 = arith.constant 0 : index
    %c0_4 = arith.constant 0 : index
    %3 = vector.load %arg4[%c0_3, %c0_4] : memref<1x256xf32, #tpu.memory_space<vmem>>, vector<1x256xf32>
    %4 = vector.broadcast %3 : vector<1x256xf32> to vector<32x256xf32>
    %5 = arith.subf %2, %4 : vector<32x256xf32>
    %6 = tpu.iota {dimensions = array<i32: 1>} : vector<32x256xi32>
    %cst_5 = arith.constant dense<0xFF800000> : vector<32xf32>
    %7 = vector.multi_reduction <maximumf>, %5, %cst_5 [1] : vector<32x256xf32> to vector<32xf32>
    %8 = vector.shape_cast %7 : vector<32xf32> to vector<32x1xf32>
    %9 = vector.broadcast %8 : vector<32x1xf32> to vector<32x256xf32>
    %10 = arith.cmpf oeq, %5, %9 : vector<32x256xf32>
    %c256_i32 = arith.constant 256 : i32
    %11 = vector.broadcast %c256_i32 : i32 to vector<32x256xi32>
    %12 = arith.select %10, %6, %11 : vector<32x256xi1>, vector<32x256xi32>
    %cst_6 = arith.constant dense<2147483647> : vector<32xi32>
    %13 = vector.multi_reduction <minsi>, %12, %cst_6 [1] : vector<32x256xi32> to vector<32xi32>
    %14 = vector.shape_cast %13 : vector<32xi32> to vector<1x32xi32>
    %c0_7 = arith.constant 0 : index
    %c0_8 = arith.constant 0 : index
    %15 = vector.load %arg6[%c0_7, %c0_8] : memref<1x32xi32, #tpu.memory_space<vmem>>, vector<1x32xi32>
    tpu.vector_store %arg6[%c0_7, %c0_8], %14 {strides = array<i32>} : memref<1x32xi32, #tpu.memory_space<vmem>>, vector<1x32xi32>,
    %16 = vector.shape_cast %13 : vector<32xi32> to vector<32x1xi32>
    %17 = vector.broadcast %16 : vector<32x1xi32> to vector<32x256xi32>
    %18 = arith.cmpi eq, %6, %17 : vector<32x256xi32>
    %19 = arith.extui %18 : vector<32x256xi1> to vector<32x256xi32>
    %20 = arith.sitofp %19 : vector<32x256xi32> to vector<32x256xf32>
    %c0_9 = arith.constant 0 : index
    %c0_10 = arith.constant 0 : index
    %21 = vector.load %arg3[%c0_9, %c0_10] : memref<256x64xf32, #tpu.memory_space<vmem>>, vector<256x64xf32>
    %cst_11 = arith.constant dense<0.000000e+00> : vector<32x64xf32>
    %22 = tpu.matmul %20, %21, %cst_11 {dimension_numbers = #tpu.dot_dimension_numbers<[1], [0], [0], [1], [0, 0, 1, 1], [], []>} : vector<32x256xf32>, vector<256x64xf32>, vector<32x64xf32> -> vector<32x64xf32>
    %c0_12 = arith.constant 0 : index
    %c0_13 = arith.constant 0 : index
    %23 = vector.load %arg5[%c0_12, %c0_13] : memref<32x64xf32, #tpu.memory_space<vmem>>, vector<32x64xf32>
    tpu.vector_store %arg5[%c0_12, %c0_13], %22 {strides = array<i32>} : memref<32x64xf32, #tpu.memory_space<vmem>>, vector<32x64xf32>,
    return
  }
  func.func @transform_0(%arg0: i32) -> (i32, i32) {
    %c0_i32 = arith.constant 0 : i32
    %c0_i32_0 = arith.constant 0 : i32
    return %arg0, %c0_i32 : i32, i32
  }
  func.func @transform_1(%arg0: i32) -> (i32, i32) {
    %c0_i32 = arith.constant 0 : i32
    %c0_i32_0 = arith.constant 0 : i32
    %c0_i32_1 = arith.constant 0 : i32
    return %c0_i32, %c0_i32_0 : i32, i32
  }
  func.func @transform_2(%arg0: i32) -> (i32, i32) {
    %c0_i32 = arith.constant 0 : i32
    %c0_i32_0 = arith.constant 0 : i32
    %c0_i32_1 = arith.constant 0 : i32
    return %c0_i32, %c0_i32_0 : i32, i32
  }
  func.func @transform_3(%arg0: i32) -> (i32, i32) {
    %c0_i32 = arith.constant 0 : i32
    %c0_i32_0 = arith.constant 0 : i32
    %c0_i32_1 = arith.constant 0 : i32
    return %c0_i32, %c0_i32_0 : i32, i32
  }
  func.func @transform_4(%arg0: i32) -> (i32, i32) {
    %c0_i32 = arith.constant 0 : i32
    %c0_i32_0 = arith.constant 0 : i32
    return %arg0, %c0_i32 : i32, i32
  }
  func.func @transform_5(%arg0: i32) -> (i32, i32) {
    %c0_i32 = arith.constant 0 : i32
    %c0_i32_0 = arith.constant 0 : i32
    return %c0_i32, %arg0 : i32, i32
  }
}

</mosaic_0001>

<bundles_post_ra>
// kernel: tpu_custom_call.1
= control target key start
LH: loop header
LB: loop body
LE: loop exit
PB: predicated region body
PF: predicated region fallthrough
CT: control target
= control target key end

     0   :  { %11 = vsyncpa [#allocation3], 0  ;;  %v574_v4 = vmov 0.0   ;;  %s848_s0 = inlined_call_operand.vmem [shape: f32[32,64], index: 0, kind: input, shape index: {}]   ;;  %s849_s1 = inlined_call_operand.vmem [shape: f32[64,256], index: 1, kind: input, shape index: {}]   ;;  %s850_s2 = inlined_call_operand.vmem [shape: f32[256,64], index: 2, kind: input, shape index: {}]   ;;  %s851_s3 = inlined_call_operand.vmem [shape: f32[1,256], index: 3, kind: input, shape index: {}]   ;;  %s852_s4 = inlined_call_operand.hbm [shape: f32[32,64], index: 4, kind: output, shape index: {0}]   ;;  %s853_s5 = inlined_call_operand.hbm [shape: s32[1,32], index: 5, kind: output, shape index: {1}]  }
   0x1   :  { %v40_v0 = vld [vmem:[%s849_s1 + $0x78] sm:$0xff]  ;;  %v39_v1 = vld [vmem:[%s849_s1 + $0x70] sm:$0xff]  ;;  %v38_v2 = vld [vmem:[%s849_s1 + $0x68] sm:$0xff]  ;;  %118 = vmatprep.mubr.f32.mxu0 %v574_v4 }
   0x2   :  { %70 = vmatprep.subr.mxu0 %v40_v0  ;;  %v37_v3 = vld [vmem:[%s849_s1 + $0x60] sm:$0xff]  ;;  %v36_v5 = vld [vmem:[%s849_s1 + $0x58] sm:$0xff]  ;;  %v35_v6 = vld [vmem:[%s849_s1 + $0x50] sm:$0xff] }
   0x3   :  { %71 = vmatpush1.msra.mxu0 %v39_v1  ;;  %v34_v7 = vld [vmem:[%s849_s1 + $0x48] sm:$0xff]  ;;  %v33_v8 = vld [vmem:[%s849_s1 + $0x40] sm:$0xff]  ;;  %v32_v9 = vld [vmem:[%s849_s1 + $0x38] sm:$0xff] }
   0x4   :  { %72 = vmatprep.subr.mxu0 %v38_v2 }
   0x5   :  { %73 = vmatpush1.msra.mxu0 %v37_v3 }
   0x6   :  { %74 = vmatprep.subr.mxu0 %v36_v5 }
   0x7   :  { %75 = vmatpush1.msra.mxu0 %v35_v6 }
   0x8   :  { %12 = vsyncpa [#allocation5], 0  ;;  %76 = vmatprep.subr.mxu0 %v34_v7  ;;  %v31_v10 = vld [vmem:[%s849_s1 + $0x30] sm:$0xff]  ;;  %v30_v11 = vld [vmem:[%s849_s1 + $0x28] sm:$0xff]  ;;  %vm41_vm0 = vcmask 523264   ;;  %v145_v21 = vlaneseq }
   0x9   :  { %77 = vmatpush1.msra.mxu0 %v33_v8  ;;  %v29_v12 = vld [vmem:[%s849_s1 + $0x20] sm:$0xff]  ;;  %v28_v13 = vld [vmem:[%s849_s1 + $0x18] sm:$0xff]  ;;  %v27_v14 = vld [vmem:[%s849_s1 + $0x10] sm:$0xff] }
   0xa   :  { %78 = vmatprep.subr.mxu0 %v32_v9  ;;  %v26_v15 = vld [vmem:[%s849_s1 + $0x8] sm:$0xff]  ;;  %v25_v16 = vld [vmem:[%s849_s1] sm:$0xff]  ;;  %v23_v19 = vld [vmem:[%s848_s0 + $0x10] sm:$0xff]  ;;  %v674_v22 = vshrl.u32 %v145_v21, 7  ;;  %v681_v48 = vand.u32 127, %v145_v21 }
   0xb   :  { %79 = vmatpush1.msra.mxu0 %v31_v10  ;;  %v21_v17 = vld [vmem:[%s848_s0] sm:$0xff]  ;;  %v22_v18 = vld [vmem:[%s848_s0 + $0x8] sm:$0xff]  ;;  %v24_v20 = vld [vmem:[%s848_s0 + $0x18] sm:$0xff] }
   0xc   :  { %80 = vmatprep.subr.mxu0 %v30_v11  ;;  %v147_v23 = vsub.s32 0, %v674_v22  ;;  %v151_v24 = vsub.s32 1, %v674_v22  ;;  %v143_v25 = vld [vmem:[%s851_s3] sm:$0x3]  ;;  %v684_v49 = vadd.s32 128, %v681_v48  ;;  %v340_v10 = vld [vmem:[%s850_s2 + $0xf8] sm:$0xff] }
   0xd   :  { %81 = vmatpush1.msra.mxu0 %v29_v12  ;;  %v324_v11 = vld [vmem:[%s850_s2 + $0x78] sm:$0xff]  ;;  %v339_v12 = vld [vmem:[%s850_s2 + $0xf0] sm:$0xff]  ;;  %480 = vmatprep.subr.mxu1 %v340_v10  ;;  %v575_v10 = vmov 1.0  }
   0xe   :  { %82 = vmatprep.subr.mxu0 %v28_v13  ;;  %v148_v26 = vrot.slane %v143_v25, %v147_v23  ;;  %v152_v27 = vrot.slane %v143_v25, %v151_v24  ;;  %v323_v13 = vld [vmem:[%s850_s2 + $0x70] sm:$0xff]  ;;  %481 = vmatpush3.msra.mxu1 %v324_v11  ;;  %v334_v23 = vld [vmem:[%s850_s2 + $0xc8] sm:$0xff]  ;;  %v333_v25 = vld [vmem:[%s850_s2 + $0xc0] sm:$0xff]  ;;  %v269_v11 = vadd.s32 4294967280, %v681_v48 }
   0xf   :  { %83 = vmatpush1.msra.mxu0 %v27_v14  ;;  %v338_v14 = vld [vmem:[%s850_s2 + $0xe8] sm:$0xff]  ;;  %482 = vmatprep.subr.mxu1 %v339_v12  ;;  %v319_v21 = vld [vmem:[%s850_s2 + $0x50] sm:$0xff] }
  0x10   :  { %84 = vmatprep.subr.mxu0 %v26_v15  ;;  %v322_v15 = vld [vmem:[%s850_s2 + $0x68] sm:$0xff]  ;;  %483 = vmatpush3.msra.mxu1 %v323_v13 }
  0x11   :  { %85 = vmatpush1.msra.mxu0 %v25_v16  ;;  %v337_v16 = vld [vmem:[%s850_s2 + $0xe0] sm:$0xff]  ;;  %484 = vmatprep.subr.mxu1 %v338_v14  ;;  %v318_v24 = vld [vmem:[%s850_s2 + $0x48] sm:$0xff] }
  0x12   :  { %460 = vmatmul.mubr.msk.f32.vlgmr.msra.gmra.mxu0 %vm41_vm0, %v21_v17  ;;  %v321_v17 = vld [vmem:[%s850_s2 + $0x60] sm:$0xff]  ;;  %485 = vmatpush3.msra.mxu1 %v322_v15 }
  0x13   :  { %124 = vmatprep.mubr.f32.mxu0 %v574_v4  ;;  %486 = vmatprep.subr.mxu1 %v337_v16 }
  0x14   :  { %487 = vmatpush3.msra.mxu1 %v321_v17  ;;  %v276_v17 = vadd.s32 4294967272, %v681_v48 }
  0x16   :  { %461 = vmatmul.mubr.msk.f32.gmra.mxu0 %vm41_vm0, %v22_v18  ;;  %v336_v18 = vld [vmem:[%s850_s2 + $0xd8] sm:$0xff] }
  0x17   :  { %130 = vmatprep.mubr.f32.mxu0 %v574_v4  ;;  %488 = vmatprep.subr.mxu1 %v336_v18 }
  0x1a   :  { %462 = vmatmul.mubr.msk.f32.gmra.mxu0 %vm41_vm0, %v23_v19  ;;  %v320_v19 = vld [vmem:[%s850_s2 + $0x58] sm:$0xff] }
  0x1b   :  { %136 = vmatprep.mubr.f32.mxu0 %v574_v4  ;;  %489 = vmatpush3.msra.mxu1 %v320_v19 }
  0x1e   :  { %463 = vmatmul.mubr.msk.f32.gmra.mxu0 %vm41_vm0, %v24_v20  ;;  %v335_v20 = vld [vmem:[%s850_s2 + $0xd0] sm:$0xff] }
  0x1f   :  { %490 = vmatprep.subr.mxu1 %v335_v20  ;;  %v272_v20 = vsub.s32 %v269_v11, %v674_v22 }
  0x20   :  { %491 = vmatpush3.msra.mxu1 %v319_v21 }
  0x21   :  { %492 = vmatprep.subr.mxu1 %v334_v23 }
  0x22   :  { %493 = vmatpush3.msra.mxu1 %v318_v24 }
  0x23   :  { %494 = vmatprep.subr.mxu1 %v333_v25 }
  0xd2   :  { %v120_v28 = vpop.f32.mrf.mxu0 }
  0xd3   :  { %v155_v30 = vsub.f32 %v120_v28, %v148_v26  ;;  %v316_v28 = vld [vmem:[%s850_s2 + $0x38] sm:$0xff] }
  0xd4   :  { %v122_v29 = vpop.f32.mrf.mxu0 }
  0xd5   :  { %v156_v31 = vsub.f32 %v122_v29, %v152_v27  ;;  %v331_v29 = vld [vmem:[%s850_s2 + $0xb0] sm:$0xff] }
  0xd6   :  { %v126_v32 = vpop.f32.mrf.mxu0 }
  0xd7   :  { %v166_v33 = vmax.f32 %v155_v30, %v156_v31  ;;  %v157_v35 = vsub.f32 %v126_v32, %v148_v26  ;;  %v314_v32 = vld [vmem:[%s850_s2 + $0x28] sm:$0xff] }
  0xd8   :  { %v128_v34 = vpop.f32.mrf.mxu0 }
  0xd9   :  { %v158_v36 = vsub.f32 %v128_v34, %v152_v27  ;;  %167 = vmax.xlane.f32.xlu0 %v166_v33  ;;  %v329_v33 = vld [vmem:[%s850_s2 + $0xa0] sm:$0xff] }
  0xda   :  { %v132_v37 = vpop.f32.mrf.mxu0  ;;  %v313_v34 = vld [vmem:[%s850_s2 + $0x20] sm:$0xff] }
  0xdb   :  { %v169_v38 = vmax.f32 %v157_v35, %v158_v36  ;;  %v159_v40 = vsub.f32 %v132_v37, %v148_v26 }
  0xdc   :  { %v134_v39 = vpop.f32.mrf.mxu0 }
  0xdd   :  { %v160_v41 = vsub.f32 %v134_v39, %v152_v27  ;;  %170 = vmax.xlane.f32.xlu0 %v169_v38 }
  0xde   :  { %v138_v42 = vpop.f32.mrf.mxu0 }
  0xdf   :  { %v172_v43 = vmax.f32 %v159_v40, %v160_v41  ;;  %v161_v45 = vsub.f32 %v138_v42, %v148_v26  ;;  %v317_v26 = vld [vmem:[%s850_s2 + $0x40] sm:$0xff] }
  0xe0   :  { %v140_v44 = vpop.f32.mrf.mxu0  ;;  %495 = vmatpush3.msra.mxu1 %v317_v26  ;;  %v279_v26 = vsub.s32 %v276_v17, %v674_v22 }
  0xe1   :  { %v162_v46 = vsub.f32 %v140_v44, %v152_v27  ;;  %173 = vmax.xlane.f32.xlu1 %v172_v43  ;;  %v332_v27 = vld [vmem:[%s850_s2 + $0xb8] sm:$0xff] }
  0xe2   :  { %496 = vmatprep.subr.mxu1 %v332_v27 }
  0xe3   :  { %v175_v47 = vmax.f32 %v161_v45, %v162_v46  ;;  %497 = vmatpush3.msra.mxu1 %v316_v28 }
  0xe4   :  { %498 = vmatprep.subr.mxu1 %v331_v29 }
  0xe5   :  { %176 = vmax.xlane.f32.xlu1 %v175_v47 }
 0x162   :  { %v168_v50 = vpop.xlane.xlu0 %167 }
 0x163   :  { %vm178_vm1 = vcmp.eq.f32.partialorder %v155_v30, %v168_v50  ;;  %vm179_vm2 = vcmp.eq.f32.partialorder %v156_v31, %v168_v50  ;;  %v315_v30 = vld [vmem:[%s850_s2 + $0x30] sm:$0xff]  ;;  %v330_v31 = vld [vmem:[%s850_s2 + $0xa8] sm:$0xff] }
 0x164   :  { %v186_v51 = vsel %vm178_vm1, %v681_v48, 256  ;;  %v187_v52 = vsel %vm179_vm2, %v684_v49, 256  ;;  %499 = vmatpush3.msra.mxu1 %v315_v30 }
 0x165   :  { %vm194_vm3 = vcmp.lt.s32.totalorder %v186_v51, %v187_v52  ;;  %500 = vmatprep.subr.mxu1 %v330_v31 }
 0x166   :  { %v171_v53 = vpop.xlane.xlu0 %170  ;;  %v688_v54 = vsel %vm194_vm3, %v186_v51, %v187_v52  ;;  %501 = vmatpush3.msra.mxu1 %v314_v32 }
 0x167   :  { %vm180_vm4 = vcmp.eq.f32.partialorder %v157_v35, %v171_v53  ;;  %vm181_vm5 = vcmp.eq.f32.partialorder %v158_v36, %v171_v53  ;;  %v197_v55 = vshra.s32 %v688_v54, 16  ;;  %v328_v35 = vld [vmem:[%s850_s2 + $0x98] sm:$0xff]  ;;  %502 = vmatprep.subr.mxu1 %v329_v33  ;;  %v196_v37 = vand.u32 65535, %v688_v54  ;;  %v327_v54 = vld [vmem:[%s850_s2 + $0x90] sm:$0xff] }
 0x168   :  { %v188_v56 = vsel %vm180_vm4, %v681_v48, 256  ;;  %v189_v57 = vsel %vm181_vm5, %v684_v49, 256  ;;  %v312_v36 = vld [vmem:[%s850_s2 + $0x18] sm:$0xff]  ;;  %503 = vmatpush3.msra.mxu1 %v313_v34  ;;  %vm267_vm4 = vcmask 130112  }
 0x169   :  { %vm210_vm6 = vcmp.lt.s32.totalorder %v188_v56, %v189_v57  ;;  %v693_v58 = vcvt.s32.f32 %v197_v55  ;;  %504 = vmatprep.subr.mxu1 %v328_v35  ;;  %v198_v39 = vcvt.s32.f32 %v196_v37  ;;  %v311_v55 = vld [vmem:[%s850_s2 + $0x10] sm:$0xff] }
 0x16a   :  { %v174_v59 = vpop.xlane.xlu1 %173  ;;  %v695_v60 = vsel %vm210_vm6, %v188_v56, %v189_v57  ;;  %505 = vmatpush3.msra.mxu1 %v312_v36  ;;  %v326_v57 = vld [vmem:[%s850_s2 + $0x88] sm:$0xff] }
 0x16b   :  { %vm182_vm7 = vcmp.eq.f32.partialorder %v159_v40, %v174_v59  ;;  %vm183_vm8 = vcmp.eq.f32.partialorder %v160_v41, %v174_v59  ;;  %200 = vmin.xlane.f32.xlu0 %v693_v58  ;;  %v213_v61 = vshra.s32 %v695_v60, 16  ;;  %v212_v40 = vand.u32 65535, %v695_v60  ;;  %506 = vmatprep.subr.mxu1 %v327_v54  ;;  %v325_v59 = vld [vmem:[%s850_s2 + $0x80] sm:$0xff] }
 0x16c   :  { %v190_v62 = vsel %vm182_vm7, %v681_v48, 256  ;;  %v191_v63 = vsel %vm183_vm8, %v684_v49, 256  ;;  %507 = vmatpush3.msra.mxu1 %v311_v55  ;;  %v309_v60 = vld [vmem:[%s850_s2] sm:$0xff] }
 0x16d   :  { %vm226_vm9 = vcmp.lt.s32.totalorder %v190_v62, %v191_v63  ;;  %v701_v0 = vcvt.s32.f32 %v213_v61  ;;  %v214_v43 = vcvt.s32.f32 %v212_v40  ;;  %508 = vmatprep.subr.mxu1 %v326_v57 }
 0x16e   :  { %v177_v1 = vpop.xlane.xlu1 %176  ;;  %v703_v2 = vsel %vm226_vm9, %v190_v62, %v191_v63  ;;  %vm274_vm9 = vcmask 195712  }
 0x16f   :  { %vm184_vm10 = vcmp.eq.f32.partialorder %v161_v45, %v177_v1  ;;  %vm185_vm11 = vcmp.eq.f32.partialorder %v162_v46, %v177_v1  ;;  %216 = vmin.xlane.f32.xlu1 %v701_v0  ;;  %v229_v3 = vshra.s32 %v703_v2, 16  ;;  %v228_v44 = vand.u32 65535, %v703_v2 }
 0x170   :  { %v192_v4 = vsel %vm184_vm10, %v681_v48, 256  ;;  %v193_v5 = vsel %vm185_vm11, %v684_v49, 256  ;;  %v262_v2 = vadd.s32 4294967288, %v681_v48  ;;  %vm281_vm10 = vcmask 261312  }
 0x171   :  { %vm242_vm12 = vcmp.lt.s32.totalorder %v192_v4, %v193_v5  ;;  %v709_v6 = vcvt.s32.f32 %v229_v3  ;;  %v230_v47 = vcvt.s32.f32 %v228_v44 }
 0x172   :  { %v711_v7 = vsel %vm242_vm12, %v192_v4, %v193_v5 }
 0x173   :  { %232 = vmin.xlane.f32.xlu0 %v709_v6  ;;  %v245_v8 = vshra.s32 %v711_v7, 16  ;;  %v244_v50 = vand.u32 65535, %v711_v7 }
 0x175   :  { %v715_v9 = vcvt.s32.f32 %v245_v8  ;;  %v246_v53 = vcvt.s32.f32 %v244_v50  ;;  %v265_v8 = vsub.s32 %v262_v2, %v674_v22 }
 0x177   :  { %248 = vmin.xlane.f32.xlu1 %v715_v9 }
 0x1f4   :  { %v201_v38 = vpop.xlane.xlu0 %200 }
 0x1f5   :  { %vm202_vm13 = vcmp.eq.f32.partialorder %v693_v58, %v201_v38  ;;  %v310_v58 = vld [vmem:[%s850_s2 + $0x8] sm:$0xff]  ;;  %v207_v61 = vcvt.f32.s32 %v201_v38  ;;  %s576_s2 = smov [#allocation4]  }
 0x1f6   :  { %v203_v41 = vsel %vm202_vm13, %v198_v39, inf  ;;  %509 = vmatpush3.msra.mxu1 %v310_v58  ;;  %vm283_vm13 = vcmask 253952   ;;  %s448_s15 = sshll.u32 %s576_s2, 4  ;;  %s449_s15 = int_to_ptr.vmem [resolvable:$true] %s448_s15 }
 0x1f7   :  { %204 = vmin.xlane.f32.xlu0 %v203_v41  ;;  %510 = vmatprep.subr.mxu1 %v325_v59  ;;  %s530_s16 = scalar_lea.vmem %s449_s15, 16  ;;  %s534_s17 = scalar_lea.vmem %s449_s15, 32 }
 0x1f8   :  { %v217_v42 = vpop.xlane.xlu1 %216  ;;  %511 = vmatpush3.msra.mxu1 %v309_v60  ;;  %p531_p0 = scmp.ne.s32.totalorder %s449_s15, %s530_s16  ;;  %p535_p1 = scmp.lt.s32.totalorder %s449_s15, %s449_s15 }
 0x1f9   :  { %vm218_vm14 = vcmp.eq.f32.partialorder %v701_v0, %v217_v42  ;;  %v223_v62 = vcvt.f32.s32 %v217_v42  ;;  %v208_v0 = vshll.u32 %v207_v61, 16  ;;  %p536_p2 = scmp.lt.s32.totalorder %s534_s17, %s530_s16 }
 0x1fa   :  { %v219_v45 = vsel %vm218_vm14, %v214_v43, inf }
 0x1fb   :  { %220 = vmin.xlane.f32.xlu1 %v219_v45  ;;  %v224_v5 = vshll.u32 %v223_v62, 16  ;;  %p537_p3 = por %p536_p2, %p535_p1 }
 0x1fc   :  { %v233_v46 = vpop.xlane.xlu0 %232 }
 0x1fd   :  { %vm234_vm15 = vcmp.eq.f32.partialorder %v709_v6, %v233_v46  ;;  %v239_v3 = vcvt.f32.s32 %v233_v46  ;;  %v260_v6 = vsub.s32 %v681_v48, %v674_v22  ;;  %p538_p4 = pnand %p537_p3, %p531_p0 }
 0x1fe   :  { %v235_v51 = vsel %vm234_vm15, %v230_v47, inf }
 0x1ff   :  { %236 = vmin.xlane.f32.xlu0 %v235_v51  ;;  %v240_v12 = vshll.u32 %v239_v3, 16 }
 0x200   :  { %v249_v52 = vpop.xlane.xlu1 %248 }
 0x201   :  { %vm250_vm1 = vcmp.eq.f32.partialorder %v715_v9, %v249_v52  ;;  %v255_v14 = vcvt.f32.s32 %v249_v52 }
 0x202   :  { %v251_v56 = vsel %vm250_vm1, %v246_v53, inf }
 0x203   :  { %252 = vmin.xlane.f32.xlu1 %v251_v56  ;;  %v256_v24 = vshll.u32 %v255_v14, 16 }
 0x280   :  { %v205_v63 = vpop.xlane.xlu0 %204 }
 0x281   :  { %v206_v1 = vcvt.f32.s32 %v205_v63 }
 0x283   :  { %v209_v4 = vadd.s32 %v208_v0, %v206_v1 }
 0x284   :  { %v221_v7 = vpop.xlane.xlu1 %220 }
 0x285   :  { %v222_v9 = vcvt.f32.s32 %v221_v7  ;;  %vm286_vm2 = vcmp.eq.s32.totalorder %v684_v49, %v209_v4  ;;  %vm285_vm3 = vcmp.eq.s32.totalorder %v681_v48, %v209_v4  ;;  %v261_v15 = vrot.slane %v209_v4, %v260_v6 }
 0x286   :  { %472 = vmatprep.mubr.msk.f32.mxu1 %vm286_vm2, %v575_v10 }
 0x287   :  { %v225_v13 = vadd.s32 %v224_v5, %v222_v9  ;;  %473 = vmatmul.mubr.msk.f32.vlgmr.msra.gmra.mxu1 %vm285_vm3, %v575_v10 }
 0x288   :  { %v237_v16 = vpop.xlane.xlu0 %236 }
 0x289   :  { %v266_v18 = vrot.slane %v225_v13, %v265_v8  ;;  %v238_v19 = vcvt.f32.s32 %v237_v16  ;;  %vm288_vm5 = vcmp.eq.s32.totalorder %v684_v49, %v225_v13  ;;  %vm287_vm6 = vcmp.eq.s32.totalorder %v681_v48, %v225_v13 }
 0x28a   :  { %474 = vmatprep.mubr.msk.f32.mxu1 %vm288_vm5, %v575_v10 }
 0x28b   :  { %v241_v21 = vadd.s32 %v240_v12, %v238_v19  ;;  %475 = vmatmul.mubr.msk.f32.gmra.mxu1 %vm287_vm6, %v575_v10  ;;  %v268_v23 = vsel %vm267_vm4, %v266_v18, %v261_v15 }
 0x28c   :  { %v253_v25 = vpop.xlane.xlu1 %252 }
 0x28d   :  { %v254_v27 = vcvt.f32.s32 %v253_v25  ;;  %vm290_vm7 = vcmp.eq.s32.totalorder %v684_v49, %v241_v21  ;;  %vm289_vm8 = vcmp.eq.s32.totalorder %v681_v48, %v241_v21  ;;  %v273_v28 = vrot.slane %v241_v21, %v272_v20 }
 0x28e   :  { %476 = vmatprep.mubr.msk.f32.mxu1 %vm290_vm7, %v575_v10 }
 0x28f   :  { %v257_v29 = vadd.s32 %v256_v24, %v254_v27  ;;  %477 = vmatmul.mubr.msk.f32.gmra.mxu1 %vm289_vm8, %v575_v10  ;;  %v275_v31 = vsel %vm274_vm9, %v273_v28, %v268_v23 }
 0x291   :  { %v280_v30 = vrot.slane %v257_v29, %v279_v26  ;;  %vm292_vm11 = vcmp.eq.s32.totalorder %v684_v49, %v257_v29  ;;  %vm291_vm12 = vcmp.eq.s32.totalorder %v681_v48, %v257_v29 }
 0x292   :  { %478 = vmatprep.mubr.msk.f32.mxu1 %vm292_vm11, %v575_v10 }
 0x293   :  { %479 = vmatmul.mubr.msk.f32.gmra.mxu1 %vm291_vm12, %v575_v10  ;;  %v282_v22 = vsel %vm281_vm10, %v280_v30, %v275_v31 }
 0x294   :  { %284 = vst.msk [vmem:[#allocation4] sm:$0x1] %vm283_vm13, %v282_v22 }
 0x295   :  { %541 = shalt.err (!%p538_p4)
}
 0x296   :  { %451 = dma.vmem_to_hbm [thread:$0]  %s449_s15, 16, %s853_s5, [#allocation5]  }
 0x297   :  { %s577_s20 = smov [#allocation2]  }
 0x298   :  { %s435_s21 = sshll.u32 %s577_s20, 4  ;;  %s436_s21 = int_to_ptr.vmem [resolvable:$true] %s435_s21 }
 0x299   :  { %s550_s5 = scalar_lea.vmem %s436_s21, 512  ;;  %p555_p6 = scmp.lt.s32.totalorder %s436_s21, %s436_s21 }
 0x29a   :  { %p551_p5 = scmp.ne.s32.totalorder %s436_s21, %s550_s5  ;;  %p556_p7 = scmp.lt.s32.totalorder %s550_s5, %s550_s5 }
 0x29c   :  { %p557_p8 = por %p556_p7, %p555_p6 }
 0x29e   :  { %p558_p9 = pnand %p557_p8, %p551_p5 }
 0x347   :  { %v512_v48 = vpop.f32.mrf.mxu1 }
 0x349   :  { %v513_v49 = vpop.f32.mrf.mxu1 }
 0x34a   :  { %v514_v32 = vadd.f32 %v513_v49, %v512_v48 }
 0x34b   :  { %v515_v33 = vpop.f32.mrf.mxu1 }
 0x34c   :  { %426 = vst.msk [vmem:[#allocation2] sm:$0xff] %vm41_vm0, %v514_v32 }
 0x34d   :  { %v516_v34 = vpop.f32.mrf.mxu1 }
 0x34e   :  { %v517_v35 = vadd.f32 %v516_v34, %v515_v33 }
 0x34f   :  { %v518_v36 = vpop.f32.mrf.mxu1 }
 0x350   :  { %427 = vst.msk [vmem:[#allocation2 + $0x8] sm:$0xff] %vm41_vm0, %v517_v35 }
 0x351   :  { %v519_v37 = vpop.f32.mrf.mxu1 }
 0x352   :  { %v520_v38 = vadd.f32 %v519_v37, %v518_v36 }
 0x353   :  { %v521_v39 = vpop.f32.mrf.mxu1 }
 0x354   :  { %428 = vst.msk [vmem:[#allocation2 + $0x10] sm:$0xff] %vm41_vm0, %v520_v38 }
 0x355   :  { %v522_v40 = vpop.f32.mrf.mxu1 }
 0x356   :  { %v523_v41 = vadd.f32 %v522_v40, %v521_v39 }
 0x358   :  { %429 = vst.msk [vmem:[#allocation2 + $0x18] sm:$0xff] %vm41_vm0, %v523_v41 }
 0x359   :  { %561 = shalt.err (!%p558_p9)
}
 0x35a   :  { %s578_s22 = smov 128   ;;  %s579_s23 = smov 8  }
 0x35b   :  { %441 = dma.vmem_to_hbm [thread:$0]  %s436_s21, 512, %s852_s4, [#allocation3], %s578_s22, %s578_s22, %s579_s23  }
 0x35c   :  { %570 = dma.done.wait [#allocation3], 512  }
 0x35d   :  { %571 = vsyncadd [#allocation3], 4294966784 }
 0x35e   :  { %572 = dma.done.wait [#allocation5], 16  }
 0x35f   :  { %573 = vsyncadd [#allocation5], 4294967280 }
 0x360   :  { %458 = vsyncpa [#allocation3], 1 }
 0x361   :  { %459 = vsyncpa [#allocation5], 1 }

</bundles_post_ra>
